<compile_context>
chip_gen: v7x
topology: tpu7x:2x2x1
jax: 0.10.0
libtpu: 0.0.40
codegen_flags: <defaults>
</compile_context>

<pallas_src>
import functools

import jax
import jax.numpy as jnp
from jax.experimental import pallas as pl
from jax.experimental.pallas import tpu as pltpu


# Padded tile geometry (lane-dense; sublane padding is left to Mosaic masking).
H_PAD = 128    # lane-padded concat feature dim (real 32 + 48 = 80)
C_PAD = 128    # lane-padded num_classes (real 10)


# ----------------------------------------------------------------------------
# Single fused kernel (no grid, whole operands resident in VMEM):
#   feat   = [xc | xd] @ [Wc ; Wd] + (bias + cls)       -> [B, 128] slab
#            (clip feature occupies lanes 0:32, dino lanes 32:80 via the
#             zero-padding layout of the stacked weight — this IS the concat)
#   logits = feat @ Wh + bh                             -> [B, 128] slab
# ----------------------------------------------------------------------------
def _fused_kernel(x_ref, w_all_ref, biascls_ref, wh_ref, bh_ref, o_ref):
    x_bf16 = x_ref[...].astype(jnp.bfloat16)
    feat = jnp.dot(x_bf16, w_all_ref[...],
                   preferred_element_type=jnp.float32)
    feat = feat + biascls_ref[...]
    o_ref[...] = jnp.dot(feat.astype(jnp.bfloat16), wh_ref[...],
                         preferred_element_type=jnp.float32) + bh_ref[...]


def fused_forward(x_all, padded):
    B = x_all.shape[0]
    vmem = lambda: pl.BlockSpec(memory_space=pltpu.MemorySpace.VMEM)
    return pl.pallas_call(
        _fused_kernel,
        out_shape=jax.ShapeDtypeStruct((B, C_PAD), jnp.float32),
        in_specs=[vmem(), vmem(), vmem(), vmem(), vmem()],
        out_specs=vmem(),
    )(x_all, padded["w_all"], padded["biascls"], padded["wh"], padded["bh"])


# ----------------------------------------------------------------------------
# Glue: NCHW image -> mean over non-overlapping patches -> [B, C*p*p]
# (equivalent to mean over the N patch tokens of the flattened-patch matrix)
# ----------------------------------------------------------------------------
def pool_patches(x_nchw, patch):
    B, C, H, W = x_nchw.shape
    hp, wp = H // patch, W // patch
    x = x_nchw.reshape(B, C, hp, patch, wp, patch)
    pooled = jnp.mean(x, axis=(2, 4))              # [B, C, p, p]
    return pooled.reshape(B, C * patch * patch)    # [B, P]


# ----------------------------------------------------------------------------
# One-time (outside jit) parameter packing:
#   * K-concat patch-embed weight   [2P, 128]  bf16  (clip rows on top)
#   * combined bias + CLS slab      [B, 128]   f32
#   * head weight / bias            [128,128] bf16 / [B,128] f32
# ----------------------------------------------------------------------------
def prepare_padded_params(params, *, P, clip_h, dino_h, num_classes, batch):
    w_all = jnp.zeros((2 * P, H_PAD), jnp.float32)
    w_all = w_all.at[:P, :clip_h].set(params["clip_w"])
    w_all = w_all.at[P:, clip_h:clip_h + dino_h].set(params["dino_w"])

    biascls = jnp.zeros((batch, H_PAD), jnp.float32)
    biascls = biascls.at[:, :clip_h].set(params["clip_b"] + params["clip_cls"])
    biascls = biascls.at[:, clip_h:clip_h + dino_h].set(
        params["dino_b"] + params["dino_cls"])

    wh = jnp.zeros((H_PAD, C_PAD), jnp.float32)
    wh = wh.at[:clip_h + dino_h, :num_classes].set(params["head_w"])
    bh = jnp.zeros((batch, C_PAD), jnp.float32)
    bh = bh.at[:, :num_classes].set(params["head_b"])

    return {
        "w_all": w_all.astype(jnp.bfloat16),
        "biascls": biascls,
        "wh": wh.astype(jnp.bfloat16),
        "bh": bh,
    }


# ----------------------------------------------------------------------------
# Full forward: pool patches, concat clip|dino along K, one fused Pallas
# kernel, slice the real [B, num_classes] logits (fused inside the jit).
# ----------------------------------------------------------------------------
def model_forward(padded, clip_x, dino_x, *, patch, num_classes):
    xc = pool_patches(clip_x, patch)                    # [B, P]
    xd = pool_patches(dino_x, patch)                    # [B, P]
    x_all = jnp.concatenate([xc, xd], axis=1)           # [B, 2P]
    out_pad = fused_forward(x_all, padded)              # [B, 128]
    return out_pad[:, :num_classes]


# Pure-JAX references of the same stand-in math.
def reference_forward_f32(params, clip_x, dino_x, *, patch):
    xc = pool_patches(clip_x, patch)
    xd = pool_patches(dino_x, patch)
    clip_cls = xc @ params["clip_w"] + params["clip_b"] + params["clip_cls"]
    dino_cls = xd @ params["dino_w"] + params["dino_b"] + params["dino_cls"]
    feat = jnp.concatenate([clip_cls, dino_cls], axis=1)
    return feat @ params["head_w"] + params["head_b"]


def reference_forward_bf16(params, clip_x, dino_x, *, patch):
    # Mirrors the kernel's numerics (bf16 operands, f32 accumulation).
    bf = jnp.bfloat16
    xc = pool_patches(clip_x, patch)
    xd = pool_patches(dino_x, patch)
    clip_cls = (jnp.dot(xc.astype(bf), params["clip_w"].astype(bf),
                        preferred_element_type=jnp.float32)
                + params["clip_b"] + params["clip_cls"])
    dino_cls = (jnp.dot(xd.astype(bf), params["dino_w"].astype(bf),
                        preferred_element_type=jnp.float32)
                + params["dino_b"] + params["dino_cls"])
    feat = jnp.concatenate([clip_cls, dino_cls], axis=1)
    return (jnp.dot(feat.astype(bf), params["head_w"].astype(bf),
                    preferred_element_type=jnp.float32)
            + params["head_b"])


if __name__ == "__main__":
    # Small, deterministic configuration.
    B = 2
    IMG = 32
    PATCH = 8
    CIN = 3
    P = CIN * PATCH * PATCH          # flattened patch dim = 192
    CLIP_H = 32                      # stand-in clip hidden size
    DINO_H = 48                      # stand-in dino hidden size
    NUM_CLASSES = 10
    OUT_DIM = CLIP_H + DINO_H

    key = jax.random.PRNGKey(0)
    ks = jax.random.split(key, 9)

    params = {
        "clip_w":   jax.random.normal(ks[0], (P, CLIP_H), jnp.float32) * 0.02,
        "clip_b":   jax.random.normal(ks[1], (CLIP_H,), jnp.float32) * 0.01,
        "clip_cls": jax.random.normal(ks[2], (CLIP_H,), jnp.float32) * 0.02,
        "dino_w":   jax.random.normal(ks[3], (P, DINO_H), jnp.float32) * 0.02,
        "dino_b":   jax.random.normal(ks[4], (DINO_H,), jnp.float32) * 0.01,
        "dino_cls": jax.random.normal(ks[5], (DINO_H,), jnp.float32) * 0.02,
        "head_w":   jax.random.normal(ks[6], (OUT_DIM, NUM_CLASSES),
                                      jnp.float32) * 0.05,
        "head_b":   jnp.zeros((NUM_CLASSES,), jnp.float32),
    }

    kx = jax.random.split(jax.random.PRNGKey(0), 2)
    clip_x = jax.random.normal(kx[0], (B, CIN, IMG, IMG), jnp.float32)  # NCHW
    dino_x = jax.random.normal(kx[1], (B, CIN, IMG, IMG), jnp.float32)  # NCHW

    # Pack / pre-combine parameters ONCE, outside jit.
    padded = prepare_padded_params(params, P=P, clip_h=CLIP_H, dino_h=DINO_H,
                                   num_classes=NUM_CLASSES, batch=B)

    fwd = jax.jit(functools.partial(model_forward, patch=PATCH,
                                    num_classes=NUM_CLASSES))
    logits = fwd(padded, clip_x, dino_x)
    jax.block_until_ready(logits)

    assert logits.shape == (B, NUM_CLASSES), logits.shape
    assert logits.dtype == jnp.float32

    # Tight check against a reference that mirrors the kernel's bf16 numerics
    # (catches any layout / padding / K-concat bug).
    ref_bf16 = reference_forward_bf16(params, clip_x, dino_x, patch=PATCH)
    assert jnp.allclose(logits, ref_bf16, rtol=1e-5, atol=1e-5), (
        jnp.max(jnp.abs(logits - ref_bf16)))

    # Loose check against the pure-f32 stand-in math (bf16 operand rounding).
    ref_f32 = reference_forward_f32(params, clip_x, dino_x, patch=PATCH)
    assert jnp.allclose(logits, ref_f32, rtol=1e-2, atol=5e-3), (
        jnp.max(jnp.abs(logits - ref_f32)))

    print("KERNEL_OK")
</pallas_src>

<mosaic_0001>
module attributes {stable_mosaic.version = 11 : i64} {
  func.func @_fused_kernel(%arg0: memref<2x384xf32, #tpu.memory_space<vmem>>, %arg1: memref<384x128xbf16, #tpu.memory_space<vmem>>, %arg2: memref<2x128xf32, #tpu.memory_space<vmem>>, %arg3: memref<128x128xbf16, #tpu.memory_space<vmem>>, %arg4: memref<2x128xf32, #tpu.memory_space<vmem>>, %arg5: memref<2x128xf32, #tpu.memory_space<vmem>>) attributes {dimension_semantics = [], scalar_prefetch = 0 : i64, scratch_operands = 0 : i64, tpu.core_type = #tpu.core_type<tc>} {
    %c0 = arith.constant 0 : index
    %c0_0 = arith.constant 0 : index
    %0 = vector.load %arg0[%c0, %c0_0] : memref<2x384xf32, #tpu.memory_space<vmem>>, vector<2x384xf32>
    %1 = arith.truncf %0 : vector<2x384xf32> to vector<2x384xbf16>
    %c0_1 = arith.constant 0 : index
    %c0_2 = arith.constant 0 : index
    %2 = vector.load %arg1[%c0_1, %c0_2] : memref<384x128xbf16, #tpu.memory_space<vmem>>, vector<384x128xbf16>
    %cst = arith.constant dense<0.000000e+00> : vector<2x128xf32>
    %3 = tpu.matmul %1, %2, %cst {dimension_numbers = #tpu.dot_dimension_numbers<[1], [0], [0], [1], [0, 0, 1, 1], [], []>} : vector<2x384xbf16>, vector<384x128xbf16>, vector<2x128xf32> -> vector<2x128xf32>
    %c0_3 = arith.constant 0 : index
    %c0_4 = arith.constant 0 : index
    %4 = vector.load %arg2[%c0_3, %c0_4] : memref<2x128xf32, #tpu.memory_space<vmem>>, vector<2x128xf32>
    %5 = arith.addf %3, %4 : vector<2x128xf32>
    %6 = arith.truncf %5 : vector<2x128xf32> to vector<2x128xbf16>
    %c0_5 = arith.constant 0 : index
    %c0_6 = arith.constant 0 : index
    %7 = vector.load %arg3[%c0_5, %c0_6] : memref<128x128xbf16, #tpu.memory_space<vmem>>, vector<128x128xbf16>
    %cst_7 = arith.constant dense<0.000000e+00> : vector<2x128xf32>
    %8 = tpu.matmul %6, %7, %cst_7 {dimension_numbers = #tpu.dot_dimension_numbers<[1], [0], [0], [1], [0, 0, 1, 1], [], []>} : vector<2x128xbf16>, vector<128x128xbf16>, vector<2x128xf32> -> vector<2x128xf32>
    %c0_8 = arith.constant 0 : index
    %c0_9 = arith.constant 0 : index
    %9 = vector.load %arg4[%c0_8, %c0_9] : memref<2x128xf32, #tpu.memory_space<vmem>>, vector<2x128xf32>
    %10 = arith.addf %8, %9 : vector<2x128xf32>
    %c0_10 = arith.constant 0 : index
    %c0_11 = arith.constant 0 : index
    %11 = vector.load %arg5[%c0_10, %c0_11] : memref<2x128xf32, #tpu.memory_space<vmem>>, vector<2x128xf32>
    tpu.vector_store %arg5[%c0_10, %c0_11], %10 {strides = array<i32>} : memref<2x128xf32, #tpu.memory_space<vmem>>, vector<2x128xf32>,
    return
  }
}

</mosaic_0001>

<bundles_post_ra>
// kernel: model_forward.1
= control target key start
LH: loop header
LB: loop body
LE: loop exit
PB: predicated region body
PF: predicated region fallthrough
CT: control target
= control target key end

     0   :  { %v613_v2 = vmov 0.0   ;;  %vm614_vm0 = vmmov 0   ;;  %v28_v20 = vlaneseq  ;;  %v615_v24 = vmov 1983009808   ;;  %s784_s0 = inlined_call_operand.vmem [shape: f32[2,384], index: 0, kind: input, shape index: {}]   ;;  %s785_s1 = inlined_call_operand.vmem [shape: bf16[384,128], index: 1, kind: input, shape index: {}]   ;;  %s786_s2 = inlined_call_operand.vmem [shape: f32[2,128], index: 2, kind: input, shape index: {}]   ;;  %s787_s3 = inlined_call_operand.vmem [shape: bf16[128,128], index: 3, kind: input, shape index: {}]   ;;  %s788_s4 = inlined_call_operand.vmem [shape: f32[2,128], index: 4, kind: input, shape index: {}]   ;;  %s789_s5 = inlined_call_operand.hbm [shape: f32[2,128], index: 5, kind: output, shape index: {}]  }
   0x1   :  { %v556_v0 = vld [vmem:[%s785_s1 + $0x40] sm:$0xff]   ;;  %512 = vmatprep.subr.bf16.mxu1 %v613_v2  ;;  %528 = vmatprep.mubr.msk.bf16.mxu1 %vm614_vm0, %v613_v2  ;;  %v559_v4 = vld [vmem:[%s785_s1 + $0x48] sm:$0xff]   ;;  %v562_v7 = vld [vmem:[%s785_s1 + $0x50] sm:$0xff]   ;;  %v26_v25 = vunpack.c.l.s4 %v615_v24 }
   0x2   :  { %v557_v1 = vld [vmem:[%s785_s1] sm:$0xff]   ;;  %472 = vmatprep.subr.bf16.mxu0 %v556_v0  ;;  %v560_v5 = vld [vmem:[%s785_s1 + $0x8] sm:$0xff]   ;;  %v563_v8 = vld [vmem:[%s785_s1 + $0x10] sm:$0xff]   ;;  %v29_v26 = vshrl.u32 %v28_v20, 7 }
   0x3   :  { %v558_v3 = vld [vmem:[%s785_s1 + $0x80] sm:$0xff]   ;;  %473 = vmatpush3.bf16.msra.mxu0 %v557_v1  ;;  %v561_v6 = vld [vmem:[%s785_s1 + $0x88] sm:$0xff]   ;;  %v564_v9 = vld [vmem:[%s785_s1 + $0x90] sm:$0xff]   ;;  %v27_v29 = vunpack.c.0.s8 %v26_v25 }
   0x4   :  { %513 = vmatpush3.bf16.msra.mxu1 %v558_v3  ;;  %474 = vmatprep.subr.bf16.mxu0 %v559_v4  ;;  %v565_v10 = vld [vmem:[%s785_s1 + $0x58] sm:$0xff]   ;;  %v568_v13 = vld [vmem:[%s785_s1 + $0x60] sm:$0xff]   ;;  %v571_v16 = vld [vmem:[%s785_s1 + $0x68] sm:$0xff]  }
   0x5   :  { %514 = vmatprep.subr.bf16.mxu1 %v613_v2  ;;  %v566_v11 = vld [vmem:[%s785_s1 + $0x18] sm:$0xff]   ;;  %v569_v14 = vld [vmem:[%s785_s1 + $0x20] sm:$0xff]   ;;  %v572_v17 = vld [vmem:[%s785_s1 + $0x28] sm:$0xff]   ;;  %v30_v31 = vsub.s32 %v27_v29, %v29_v26 }
   0x6   :  { %v567_v12 = vld [vmem:[%s785_s1 + $0x98] sm:$0xff]   ;;  %v570_v15 = vld [vmem:[%s785_s1 + $0xa0] sm:$0xff]   ;;  %v573_v18 = vld [vmem:[%s785_s1 + $0xa8] sm:$0xff]  }
   0x7   :  { %475 = vmatpush3.bf16.msra.mxu0 %v560_v5  ;;  %v574_v19 = vld [vmem:[%s785_s1 + $0x70] sm:$0xff]   ;;  %v577_v23 = vld [vmem:[%s785_s1 + $0x78] sm:$0xff]   ;;  %v22_v27 = vld [vmem:[%s784_s0] sm:$0x3f] }
   0x8   :  { %515 = vmatpush3.bf16.msra.mxu1 %v561_v6  ;;  %476 = vmatprep.subr.bf16.mxu0 %v562_v7  ;;  %v575_v21 = vld [vmem:[%s785_s1 + $0x30] sm:$0xff]   ;;  %v24_v28 = vcombine.high %v22_v27, %v22_v27  ;;  %v578_v30 = vld [vmem:[%s785_s1 + $0x38] sm:$0xff]   ;;  %v31_v33 = vrot.slane %v22_v27, %v30_v31 }
   0x9   :  { %516 = vmatprep.subr.bf16.mxu1 %v613_v2  ;;  %v576_v22 = vld [vmem:[%s785_s1 + $0xb0] sm:$0xff]   ;;  %v580_v32 = vld [vmem:[%s785_s1 + $0xb8] sm:$0xff]  }
   0xa   :  { %v38_v34 = vrot.slane %v24_v28, %v30_v31  ;;  %v39_v35 = vcombine.high %v31_v33, %v31_v33 }
   0xb   :  { %477 = vmatpush3.bf16.msra.mxu0 %v563_v8 }
   0xc   :  { %517 = vmatpush3.bf16.msra.mxu1 %v564_v9  ;;  %478 = vmatprep.subr.bf16.mxu0 %v565_v10  ;;  %v45_v36 = vpack.c.bf16 %v38_v34, %v38_v34 }
   0xd   :  { %518 = vmatprep.subr.bf16.mxu1 %v613_v2 }
   0xf   :  { %479 = vmatpush3.bf16.msra.mxu0 %v566_v11 }
  0x10   :  { %519 = vmatpush3.bf16.msra.mxu1 %v567_v12  ;;  %480 = vmatprep.subr.bf16.mxu0 %v568_v13 }
  0x11   :  { %520 = vmatprep.subr.bf16.mxu1 %v613_v2 }
  0x13   :  { %481 = vmatpush3.bf16.msra.mxu0 %v569_v14 }
  0x14   :  { %521 = vmatpush3.bf16.msra.mxu1 %v570_v15  ;;  %482 = vmatprep.subr.bf16.mxu0 %v571_v16 }
  0x15   :  { %522 = vmatprep.subr.bf16.mxu1 %v613_v2 }
  0x17   :  { %483 = vmatpush3.bf16.msra.mxu0 %v572_v17 }
  0x18   :  { %523 = vmatpush3.bf16.msra.mxu1 %v573_v18  ;;  %484 = vmatprep.subr.bf16.mxu0 %v574_v19 }
  0x19   :  { %524 = vmatprep.subr.bf16.mxu1 %v613_v2 }
  0x1b   :  { %485 = vmatpush3.bf16.msra.mxu0 %v575_v21 }
  0x1c   :  { %525 = vmatpush3.bf16.msra.mxu1 %v576_v22  ;;  %486 = vmatprep.subr.bf16.mxu0 %v577_v23 }
  0x1d   :  { %526 = vmatprep.subr.bf16.mxu1 %v613_v2 }
  0x1f   :  { %487 = vmatpush3.bf16.msra.mxu0 %v578_v30 }
  0x20   :  { %527 = vmatpush3.bf16.msra.mxu1 %v580_v32  ;;  %532 = vmatprep.subr.bf16.mxu0 %v613_v2 }
  0x21   :  { %10 = vsyncpa [#allocation3], 0  ;;  %v43_v37 = vpack.c.bf16 %v31_v33, %v31_v33  ;;  %v44_v38 = vpack.c.bf16 %v39_v35, %v39_v35  ;;  %v581_v39 = vld [vmem:[%s787_s3] sm:$0xff]   ;;  %v582_v40 = vld [vmem:[%s787_s3 + $0x8] sm:$0xff]   ;;  %s616_s10 = smov [#allocation2]  }
  0x22   :  { %v583_v41 = vld [vmem:[%s787_s3 + $0x10] sm:$0xff]   ;;  %v584_v42 = vld [vmem:[%s787_s3 + $0x18] sm:$0xff]   ;;  %v585_v43 = vld [vmem:[%s787_s3 + $0x20] sm:$0xff]   ;;  %s432_s11 = sshll.u32 %s616_s10, 4  ;;  %s433_s11 = int_to_ptr.vmem [resolvable:$true] %s432_s11 }
  0x23   :  { %529 = vmatmul.mubr.bf16.vlgmr.msra.gmra.mrb[0].mxu1 %v45_v36  ;;  %271 = vmatprep.mubr.bf16.mxu0 %v44_v38  ;;  %v586_v44 = vld [vmem:[%s787_s3 + $0x28] sm:$0xff]   ;;  %v587_v45 = vld [vmem:[%s787_s3 + $0x30] sm:$0xff]   ;;  %v588_v46 = vld [vmem:[%s787_s3 + $0x38] sm:$0xff]   ;;  %p594_p1 = scmp.lt.s32.totalorder %s433_s11, %s433_s11 }
  0x24   :  { %272 = vmatmul.mubr.bf16.vlgmr.msra.gmra.mrb[0].mxu0 %v43_v37  ;;  %v94_v52 = vld [vmem:[%s786_s2] sm:$0x3]  ;;  %s589_s2 = scalar_lea.vmem %s433_s11, 32 }
  0x25   :  { %533 = vmatpush3.bf16.msra.mxu0 %v581_v39  ;;  %548 = vmatprep.mubr.msk.bf16.mxu0 %vm614_vm0, %v613_v2  ;;  %v336_v60 = vld [vmem:[%s788_s4] sm:$0x3]  ;;  %p590_p0 = scmp.ne.s32.totalorder %s433_s11, %s589_s2  ;;  %p595_p2 = scmp.lt.s32.totalorder %s589_s2, %s589_s2 }
  0x26   :  { %534 = vmatprep.subr.bf16.mxu0 %v613_v2 }
  0x27   :  { %p596_p3 = por %p595_p2, %p594_p1 }
  0x29   :  { %535 = vmatpush3.bf16.msra.mxu0 %v582_v40  ;;  %p597_p4 = pnand %p596_p3, %p590_p0 }
  0x2a   :  { %536 = vmatprep.subr.bf16.mxu0 %v613_v2 }
  0x2d   :  { %537 = vmatpush3.bf16.msra.mxu0 %v583_v41 }
  0x2e   :  { %538 = vmatprep.subr.bf16.mxu0 %v613_v2 }
  0x31   :  { %539 = vmatpush3.bf16.msra.mxu0 %v584_v42 }
  0x32   :  { %540 = vmatprep.subr.bf16.mxu0 %v613_v2 }
  0x35   :  { %541 = vmatpush3.bf16.msra.mxu0 %v585_v43 }
  0x36   :  { %542 = vmatprep.subr.bf16.mxu0 %v613_v2 }
  0x39   :  { %543 = vmatpush3.bf16.msra.mxu0 %v586_v44 }
  0x3a   :  { %544 = vmatprep.subr.bf16.mxu0 %v613_v2 }
  0x3d   :  { %545 = vmatpush3.bf16.msra.mxu0 %v587_v45 }
  0x3e   :  { %546 = vmatprep.subr.bf16.mxu0 %v613_v2 }
  0x41   :  { %547 = vmatpush3.bf16.msra.mxu0 %v588_v46 }
  0xf6   :  { %v313_v47 = vpop.f32.mrb[0].mxu1 }
  0xf7   :  { %v530_v48 = vpop.f32.mrb[1].mxu1  ;;  %v488_v49 = vpop.f32.mrb[0].mxu0 }
  0xf8   :  { %v316_v50 = vpop.f32.mrb[2].mxu1  ;;  %v489_v51 = vpop.f32.mrb[1].mxu0 }
  0xf9   :  { %v531_v53 = vpop.f32.mrb[3].mxu1  ;;  %v490_v54 = vadd.f32 %v489_v51, %v488_v49  ;;  %v491_v55 = vpop.f32.mrb[2].mxu0 }
  0xfa   :  { %v492_v56 = vpop.f32.mrb[3].mxu0 }
  0xfb   :  { %v274_v57 = vadd.f32 %v490_v54, %v94_v52 }
  0xfd   :  { %v314_v58 = vadd.f32 %v313_v47, %v274_v57 }
  0xff   :  { %v319_v59 = vpack.c.bf16 %v314_v58, %v314_v58 }
 0x101   :  { %549 = vmatmul.mubr.bf16.vlgmr.msra.gmra.mrb[4].mxu0 %v319_v59 }
 0x1d4   :  { %v419_v61 = vpop.f32.mrb[4].mxu0 }
 0x1d5   :  { %v420_v62 = vadd.f32 %v419_v61, %v336_v60  ;;  %v550_v63 = vpop.f32.mrb[5].mxu0 }
 0x1d6   :  { %v422_v0 = vpop.f32.mrb[6].mxu0 }
 0x1d7   :  { %425 = vst [vmem:[#allocation2] sm:$0x3] %v420_v62  ;;  %v551_v1 = vpop.f32.mrb[7].mxu0 }
 0x1d8   :  { %600 = shalt.err (!%p597_p4)
}
 0x1d9   :  { %s601_s4 = scalar_lea.hbm %s789_s5, 32 }
 0x1da   :  { %p602_p5 = scmp.ne.s32.totalorder %s789_s5, %s601_s4  ;;  %p605_p6 = scmp.lt.u32.totalorder %s601_s4, %s789_s5 }
 0x1dc   :  { %p607_p7 = pnand %p605_p6, %p602_p5 }
 0x1de   :  { %610 = shalt.err (!%p607_p7)
}
 0x1df   :  { %435 = dma.vmem_to_hbm [thread:$0]  %s433_s11, 32, %s789_s5, [#allocation3]  }
 0x1e0   :  { %611 = dma.done.wait [#allocation3], 32  }
 0x1e1   :  { %612 = vsyncadd [#allocation3], 4294967264 }
 0x1e2   :  { %439 = vsyncpa [#allocation3], 1 }

</bundles_post_ra>
